<compile_context>
chip_gen: v7x
topology: tpu7x:2x2x1
jax: 0.10.0
libtpu: 0.0.40
codegen_flags: <defaults>
</compile_context>

<pallas_src>
import functools
import math

import jax
import jax.numpy as jnp
from jax.experimental import pallas as pl
from jax.experimental.pallas import tpu as pltpu


# ----------------------------------------------------------------------------
# VMEM budgeting
# ----------------------------------------------------------------------------
def _vmem_budget():
    try:
        cap = int(pltpu.get_tpu_info().vmem_capacity_bytes)
    except Exception:
        cap = 64 * 1024 * 1024          # conservative (v7x-sized) fallback
    budget = int(cap * 0.70)            # working-set target (~90 MiB v5e/v6e, ~45 MiB v7x)
    limit = int(cap * 0.90)             # scoped VMEM limit handed to Mosaic
    return budget, limit


def _fused_step_bytes(bb, N, D, F):
    """Conservative per-grid-step VMEM footprint of the fully-fused kernel."""
    bf16, f32 = 2, 4
    streamed = 2 * (bb * N * N * bf16          # adjacency block (double-buffered)
                    + bb * N * D * bf16        # feature block
                    + bb * N * F * f32)        # output block
    weights = 2 * ((2 * D * F + 2 * F * F) * bf16 + 2 * F * f32)
    live = (bb * N * N * bf16                  # adjacency value
            + bb * N * (2 * D + 8 * F) * f32   # h, agg, pre-activations (f32)
            + bb * N * (3 * D + 3 * F) * bf16) # bf16 copies feeding the MXU
    return streamed + weights + live


def _rowtile_step_bytes(rt, N, D, F):
    """Per-grid-step VMEM footprint of the row-tiled per-layer kernel (bb=1)."""
    bf16, f32 = 2, 4
    W = max(D, F)                              # widest layer input
    resident_x = 2 * N * W * bf16              # all source-node features
    streamed = 2 * (rt * N * bf16 + rt * W * bf16 + rt * F * f32)
    weights = 2 * (2 * W * F * bf16 + F * f32)
    live = rt * N * bf16 + rt * (2 * W + 6 * F) * f32
    return resident_x + streamed + weights + live


def _pick_batch_block(B, N, D, F, budget):
    """Largest divisor of B that fits the budget; None if even bb=1 does not fit."""
    divisors = [d for d in range(1, B + 1) if B % d == 0]
    feasible = [d for d in divisors if _fused_step_bytes(d, N, D, F) <= budget]
    if not feasible:
        return None
    # Keep >= 2 grid steps when B >= 2 so v7x's second TensorCore has work.
    cap = B // 2 if B >= 2 else B
    capped = [d for d in feasible if d <= cap]
    return max(capped) if capped else min(feasible)


def _pick_row_tile(N, D, F, budget):
    cands = sorted({N} | {r for r in range(16, N, 16) if N % r == 0}, reverse=True)
    for rt in cands:
        if _rowtile_step_bytes(rt, N, D, F) <= budget:
            return rt
    return cands[-1]


# ----------------------------------------------------------------------------
# Fully fused kernel (adjacency read from HBM exactly once; h never leaves VMEM)
# ----------------------------------------------------------------------------
def _fused_gcn_kernel(feat_ref, adj_ref, w1_ref, b1_ref, w2_ref, b2_ref, out_ref,
                      *, bb, n, d_in, d_hid):
    feat = feat_ref[...]                          # (bb, N, D)  bf16
    adj = adj_ref[...]                            # (bb, N, N)  bf16

    def graph_conv(x_b3, w_ref_, b_ref_, din, dout):
        x2 = x_b3.reshape(bb * n, din)            # leading-dim collapse (no relayout)
        if dout < din:
            # Project first so the NxN contraction runs at width dout (= min).
            ws = w_ref_[0:din, :]
            wa = w_ref_[din:2 * din, :]
            self_term = jnp.dot(x2, ws, preferred_element_type=jnp.float32)
            xw = jnp.dot(x2, wa, preferred_element_type=jnp.float32)
            xw = xw.astype(jnp.bfloat16).reshape(bb, n, dout)
            agg_term = jnp.einsum("bij,bjd->bid", adj, xw,
                                  preferred_element_type=jnp.float32)
            pre = self_term + agg_term.reshape(bb * n, dout)
        else:
            # cat([x, A@x]) @ W_full : one K = 2*din MXU dot (fewer tiny-K pushes).
            agg = jnp.einsum("bij,bjd->bid", adj, x_b3,
                             preferred_element_type=jnp.float32)
            cat = jnp.concatenate(
                [x2, agg.reshape(bb * n, din).astype(jnp.bfloat16)], axis=-1)
            pre = jnp.dot(cat, w_ref_[...], preferred_element_type=jnp.float32)
        return jnp.maximum(pre + b_ref_[...], 0.0)           # (bb*N, dout) f32

    # Layer 1: h = relu(conv1(x, A))
    h = graph_conv(feat, w1_ref, b1_ref, d_in, d_hid)
    # Layer 2 + residual: out = relu(relu(conv2(h, A)) + h)   (h stays f32 in VMEM)
    h_b3 = h.astype(jnp.bfloat16).reshape(bb, n, d_hid)
    y = graph_conv(h_b3, w2_ref, b2_ref, d_hid, d_hid)
    out = jnp.maximum(y + h, 0.0)
    out_ref[...] = out.reshape(bb, n, d_hid).astype(out_ref.dtype)


def _gcn_fused_call(x_b, adj_b, w1, b1, w2, b2, *, bb, vmem_limit):
    B, N, D = x_b.shape
    F = b1.shape[1]
    grid = (B // bb,)
    kernel = functools.partial(_fused_gcn_kernel, bb=bb, n=N, d_in=D, d_hid=F)
    flops = 2 * B * N * N * (D + F) + 2 * B * N * (2 * D * F + 2 * F * F)
    bytes_acc = (adj_b.size * 2 + x_b.size * 2 + B * N * F * 4
                 + (w1.size + w2.size) * 2 + (b1.size + b2.size) * 4)
    return pl.pallas_call(
        kernel,
        out_shape=jax.ShapeDtypeStruct((B, N, F), jnp.float32),
        grid=grid,
        in_specs=[
            pl.BlockSpec((bb, N, D), lambda i: (i, 0, 0)),       # features
            pl.BlockSpec((bb, N, N), lambda i: (i, 0, 0)),       # adjacency (read once)
            pl.BlockSpec((2 * D, F), lambda i: (0, 0)),          # W1 (resident)
            pl.BlockSpec((1, F), lambda i: (0, 0)),              # b1
            pl.BlockSpec((2 * F, F), lambda i: (0, 0)),          # W2 (resident)
            pl.BlockSpec((1, F), lambda i: (0, 0)),              # b2
        ],
        out_specs=pl.BlockSpec((bb, N, F), lambda i: (i, 0, 0)),
        compiler_params=pltpu.CompilerParams(
            dimension_semantics=("parallel",), vmem_limit_bytes=vmem_limit),
        cost_estimate=pl.CostEstimate(flops=flops, transcendentals=0,
                                      bytes_accessed=bytes_acc),
    )(x_b, adj_b, w1, b1, w2, b2)


# ----------------------------------------------------------------------------
# Row-tiled per-layer kernel (large-N fallback): adjacency/output tiled over
# output-node rows, full per-batch source-node features resident in VMEM.
# ----------------------------------------------------------------------------
def _graph_conv_rowtiled_kernel(x_all_ref, x_rows_ref, adj_ref, w_ref, b_ref, out_ref,
                                *, bb, rt, din, dout, add_residual):
    x_all = x_all_ref[...]                        # (bb, N, din)  bf16, resident
    x_rows = x_rows_ref[...]                      # (bb, rt, din) bf16
    adj_rows = adj_ref[...]                       # (bb, rt, N)   bf16
    agg = jnp.einsum("bij,bjd->bid", adj_rows, x_all,
                     preferred_element_type=jnp.float32)          # (bb, rt, din)
    cat = jnp.concatenate(
        [x_rows.reshape(bb * rt, din),
         agg.reshape(bb * rt, din).astype(jnp.bfloat16)], axis=-1)
    y = jnp.dot(cat, w_ref[...], preferred_element_type=jnp.float32) + b_ref[...]
    y = jnp.maximum(y, 0.0)
    if add_residual:                              # layer 2: relu(conv2(h) + h)
        y = jnp.maximum(y + x_rows.reshape(bb * rt, din).astype(jnp.float32), 0.0)
    out_ref[...] = y.reshape(bb, rt, dout).astype(out_ref.dtype)


def _graph_conv_rowtiled(x, adj, w, b, *, add_residual, out_dtype, rt, vmem_limit):
    B, N, Din = x.shape
    Dout = w.shape[1]
    if add_residual:
        assert Din == Dout
    bb = 1
    grid = (B // bb, N // rt)
    kernel = functools.partial(_graph_conv_rowtiled_kernel, bb=bb, rt=rt,
                               din=Din, dout=Dout, add_residual=add_residual)
    flops = 2 * B * N * N * Din + 2 * B * N * 2 * Din * Dout
    bytes_acc = (adj.size * 2 + 2 * x.size * 2 + w.size * 2 + b.size * 4
                 + B * N * Dout * jnp.dtype(out_dtype).itemsize)
    return pl.pallas_call(
        kernel,
        out_shape=jax.ShapeDtypeStruct((B, N, Dout), out_dtype),
        grid=grid,
        in_specs=[
            pl.BlockSpec((bb, N, Din), lambda i, r: (i, 0, 0)),    # all source nodes (resident over r)
            pl.BlockSpec((bb, rt, Din), lambda i, r: (i, r, 0)),   # self-feature / residual rows
            pl.BlockSpec((bb, rt, N), lambda i, r: (i, r, 0)),     # adjacency row tile
            pl.BlockSpec((2 * Din, Dout), lambda i, r: (0, 0)),    # W (resident)
            pl.BlockSpec((1, Dout), lambda i, r: (0, 0)),          # bias
        ],
        out_specs=pl.BlockSpec((bb, rt, Dout), lambda i, r: (i, r, 0)),
        compiler_params=pltpu.CompilerParams(
            dimension_semantics=("parallel", "parallel"),
            vmem_limit_bytes=vmem_limit),
        cost_estimate=pl.CostEstimate(flops=flops, transcendentals=0,
                                      bytes_accessed=bytes_acc),
    )(x, x, adj, w, b)


# ----------------------------------------------------------------------------
# Public forward
# ----------------------------------------------------------------------------
@functools.partial(jax.jit, static_argnames=("force_row_tiled", "row_tile"))
def gcn_forward(x, adj, params, *, force_row_tiled=False, row_tile=None):
    """x: (B, N, feature_dim) f32, adj: (B, N, N) row-normalized. -> (B, N, nhid) f32."""
    B, N, D = x.shape
    F = params["b1"].shape[0]
    assert params["w1"].shape == (2 * D, F)
    assert params["w2"].shape == (2 * F, F)

    budget, vmem_limit = _vmem_budget()

    x_b = x.astype(jnp.bfloat16)
    adj_b = adj.astype(jnp.bfloat16)
    w1 = params["w1"].astype(jnp.bfloat16)
    w2 = params["w2"].astype(jnp.bfloat16)
    b1 = params["b1"].reshape(1, F).astype(jnp.float32)
    b2 = params["b2"].reshape(1, F).astype(jnp.float32)

    bb = None if force_row_tiled else _pick_batch_block(B, N, D, F, budget)
    if bb is not None:
        return _gcn_fused_call(x_b, adj_b, w1, b1, w2, b2, bb=bb, vmem_limit=vmem_limit)

    # Large-N fallback: adjacency read twice (once per layer), h round-trips HBM in bf16.
    rt = row_tile if row_tile is not None else _pick_row_tile(N, D, F, budget)
    assert N % rt == 0 and (rt % 16 == 0 or rt == N), (N, rt)
    h = _graph_conv_rowtiled(x_b, adj_b, w1, b1, add_residual=False,
                             out_dtype=jnp.bfloat16, rt=rt, vmem_limit=vmem_limit)
    return _graph_conv_rowtiled(h, adj_b, w2, b2, add_residual=True,
                                out_dtype=jnp.float32, rt=rt, vmem_limit=vmem_limit)


# ----------------------------------------------------------------------------
# Params / reference
# ----------------------------------------------------------------------------
def init_gcn_params(key, feature_dim, nhid):
    k1, k2 = jax.random.split(key)

    def xavier(k, fan_in, fan_out):
        bound = math.sqrt(6.0 / (fan_in + fan_out))
        return jax.random.uniform(k, (fan_in, fan_out), jnp.float32,
                                  minval=-bound, maxval=bound)

    return {
        "w1": xavier(k1, 2 * feature_dim, nhid),
        "b1": jnp.zeros((nhid,), jnp.float32),
        "w2": xavier(k2, 2 * nhid, nhid),
        "b2": jnp.zeros((nhid,), jnp.float32),
    }


def gcn_reference(x, adj, params):
    """Plain-JAX f32 reference mirroring the PyTorch forward exactly (dropout=0)."""
    def conv(feat, A, w, b):
        agg = jnp.einsum("bij,bjd->bid", A, feat)
        cat = jnp.concatenate([feat, agg], axis=-1)
        return jax.nn.relu(jnp.einsum("bnd,df->bnf", cat, w) + b)

    h = conv(x, adj, params["w1"], params["b1"])
    return jax.nn.relu(conv(h, adj, params["w2"], params["b2"]) + h)


if __name__ == "__main__":
    key = jax.random.PRNGKey(0)
    kx, ka, kp, kx2, ka2 = jax.random.split(key, 5)

    B, N, feature_dim, nhid = 2, 16, 8, 32
    params = init_gcn_params(kp, feature_dim, nhid)

    # --- test 1: fused single-call path (small shapes) ---
    x = jax.random.normal(kx, (B, N, feature_dim), jnp.float32)
    adj_raw = jax.random.uniform(ka, (B, N, N), jnp.float32)
    adj = adj_raw / jnp.sum(adj_raw, axis=-1, keepdims=True)   # row-normalized ("mean")

    out = gcn_forward(x, adj, params)
    jax.block_until_ready(out)
    ref = gcn_reference(x, adj, params)
    assert out.shape == (B, N, nhid)
    err1 = float(jnp.max(jnp.abs(out - ref)))
    assert jnp.allclose(out, ref, atol=5e-2, rtol=5e-2), f"fused path max abs err {err1}"

    # --- test 2: row-tiled large-N fallback path (forced at a modest shape) ---
    N2 = 32
    x2 = jax.random.normal(kx2, (B, N2, feature_dim), jnp.float32)
    adj2_raw = jax.random.uniform(ka2, (B, N2, N2), jnp.float32)
    adj2 = adj2_raw / jnp.sum(adj2_raw, axis=-1, keepdims=True)

    out2 = gcn_forward(x2, adj2, params, force_row_tiled=True, row_tile=16)
    jax.block_until_ready(out2)
    ref2 = gcn_reference(x2, adj2, params)
    err2 = float(jnp.max(jnp.abs(out2 - ref2)))
    assert jnp.allclose(out2, ref2, atol=5e-2, rtol=5e-2), f"row-tiled path max abs err {err2}"

    print("KERNEL_OK")
</pallas_src>

<mosaic_0001>
module attributes {stable_mosaic.version = 11 : i64} {
  func.func @_fused_gcn_kernel(%arg0: i32, %arg1: memref<1x16x8xbf16, #tpu.memory_space<vmem>>, %arg2: memref<1x16x16xbf16, #tpu.memory_space<vmem>>, %arg3: memref<16x32xbf16, #tpu.memory_space<vmem>>, %arg4: memref<1x32xf32, #tpu.memory_space<vmem>>, %arg5: memref<64x32xbf16, #tpu.memory_space<vmem>>, %arg6: memref<1x32xf32, #tpu.memory_space<vmem>>, %arg7: memref<1x16x32xf32, #tpu.memory_space<vmem>>) attributes {dimension_semantics = [#tpu.dimension_semantics<parallel>], iteration_bounds = array<i64: 2>, scalar_prefetch = 0 : i64, scratch_operands = 0 : i64, tpu.core_type = #tpu.core_type<tc>, window_params = [{transform_indices = @transform_0, window_bounds = array<i64: 1, 16, 8>}, {transform_indices = @transform_1, window_bounds = array<i64: 1, 16, 16>}, {pipeline_mode = #tpu.pipeline_mode<synchronous>, transform_indices = @transform_2, window_bounds = array<i64: 16, 32>}, {pipeline_mode = #tpu.pipeline_mode<synchronous>, transform_indices = @transform_3, window_bounds = array<i64: 1, 32>}, {pipeline_mode = #tpu.pipeline_mode<synchronous>, transform_indices = @transform_4, window_bounds = array<i64: 64, 32>}, {pipeline_mode = #tpu.pipeline_mode<synchronous>, transform_indices = @transform_5, window_bounds = array<i64: 1, 32>}, {transform_indices = @transform_6, window_bounds = array<i64: 1, 16, 32>}]} {
    %c0 = arith.constant 0 : index
    %c0_0 = arith.constant 0 : index
    %c0_1 = arith.constant 0 : index
    %0 = vector.load %arg1[%c0, %c0_0, %c0_1] : memref<1x16x8xbf16, #tpu.memory_space<vmem>>, vector<1x16x8xbf16>
    %c0_2 = arith.constant 0 : index
    %c0_3 = arith.constant 0 : index
    %c0_4 = arith.constant 0 : index
    %1 = vector.load %arg2[%c0_2, %c0_3, %c0_4] : memref<1x16x16xbf16, #tpu.memory_space<vmem>>, vector<1x16x16xbf16>
    %2 = vector.shape_cast %0 : vector<1x16x8xbf16> to vector<16x8xbf16>
    "tpu.trace_start"() <{level = 10 : i32, message = "bij,bjd->bid"}> : () -> ()
    %cst = arith.constant dense<0.000000e+00> : vector<1x16x8xf32>
    %3 = tpu.matmul %1, %0, %cst {dimension_numbers = #tpu.dot_dimension_numbers<[2], [1], [1], [2], [0, 0, 0, 1, 1, 2], [0], [0]>} : vector<1x16x16xbf16>, vector<1x16x8xbf16>, vector<1x16x8xf32> -> vector<1x16x8xf32>
    "tpu.trace_stop"() : () -> ()
    %4 = vector.shape_cast %3 : vector<1x16x8xf32> to vector<16x8xf32>
    %5 = arith.truncf %4 : vector<16x8xf32> to vector<16x8xbf16>
    %6 = tpu.concatenate %2, %5 in 1 : vector<16x8xbf16>, vector<16x8xbf16> -> vector<16x16xbf16>
    %c0_5 = arith.constant 0 : index
    %c0_6 = arith.constant 0 : index
    %7 = vector.load %arg3[%c0_5, %c0_6] : memref<16x32xbf16, #tpu.memory_space<vmem>>, vector<16x32xbf16>
    %cst_7 = arith.constant dense<0.000000e+00> : vector<16x32xf32>
    %8 = tpu.matmul %6, %7, %cst_7 {dimension_numbers = #tpu.dot_dimension_numbers<[1], [0], [0], [1], [0, 0, 1, 1], [], []>} : vector<16x16xbf16>, vector<16x32xbf16>, vector<16x32xf32> -> vector<16x32xf32>
    %c0_8 = arith.constant 0 : index
    %c0_9 = arith.constant 0 : index
    %9 = vector.load %arg4[%c0_8, %c0_9] : memref<1x32xf32, #tpu.memory_space<vmem>>, vector<1x32xf32>
    %10 = vector.broadcast %9 : vector<1x32xf32> to vector<16x32xf32>
    %11 = arith.addf %8, %10 : vector<16x32xf32>
    %cst_10 = arith.constant 0.000000e+00 : f32
    %12 = vector.broadcast %cst_10 : f32 to vector<16x32xf32>
    %13 = arith.maximumf %11, %12 : vector<16x32xf32>
    %14 = arith.truncf %13 : vector<16x32xf32> to vector<16x32xbf16>
    %15 = vector.shape_cast %14 : vector<16x32xbf16> to vector<1x16x32xbf16>
    %16 = vector.shape_cast %15 : vector<1x16x32xbf16> to vector<16x32xbf16>
    "tpu.trace_start"() <{level = 10 : i32, message = "bij,bjd->bid"}> : () -> ()
    %cst_11 = arith.constant dense<0.000000e+00> : vector<1x16x32xf32>
    %17 = tpu.matmul %1, %15, %cst_11 {dimension_numbers = #tpu.dot_dimension_numbers<[2], [1], [1], [2], [0, 0, 0, 1, 1, 2], [0], [0]>} : vector<1x16x16xbf16>, vector<1x16x32xbf16>, vector<1x16x32xf32> -> vector<1x16x32xf32>
    "tpu.trace_stop"() : () -> ()
    %18 = vector.shape_cast %17 : vector<1x16x32xf32> to vector<16x32xf32>
    %19 = arith.truncf %18 : vector<16x32xf32> to vector<16x32xbf16>
    %20 = tpu.concatenate %16, %19 in 1 : vector<16x32xbf16>, vector<16x32xbf16> -> vector<16x64xbf16>
    %c0_12 = arith.constant 0 : index
    %c0_13 = arith.constant 0 : index
    %21 = vector.load %arg5[%c0_12, %c0_13] : memref<64x32xbf16, #tpu.memory_space<vmem>>, vector<64x32xbf16>
    %cst_14 = arith.constant dense<0.000000e+00> : vector<16x32xf32>
    %22 = tpu.matmul %20, %21, %cst_14 {dimension_numbers = #tpu.dot_dimension_numbers<[1], [0], [0], [1], [0, 0, 1, 1], [], []>} : vector<16x64xbf16>, vector<64x32xbf16>, vector<16x32xf32> -> vector<16x32xf32>
    %c0_15 = arith.constant 0 : index
    %c0_16 = arith.constant 0 : index
    %23 = vector.load %arg6[%c0_15, %c0_16] : memref<1x32xf32, #tpu.memory_space<vmem>>, vector<1x32xf32>
    %24 = vector.broadcast %23 : vector<1x32xf32> to vector<16x32xf32>
    %25 = arith.addf %22, %24 : vector<16x32xf32>
    %cst_17 = arith.constant 0.000000e+00 : f32
    %26 = vector.broadcast %cst_17 : f32 to vector<16x32xf32>
    %27 = arith.maximumf %25, %26 : vector<16x32xf32>
    %28 = arith.addf %27, %13 : vector<16x32xf32>
    %cst_18 = arith.constant 0.000000e+00 : f32
    %29 = vector.broadcast %cst_18 : f32 to vector<16x32xf32>
    %30 = arith.maximumf %28, %29 : vector<16x32xf32>
    %31 = vector.shape_cast %30 : vector<16x32xf32> to vector<1x16x32xf32>
    %c0_19 = arith.constant 0 : index
    %c0_20 = arith.constant 0 : index
    %c0_21 = arith.constant 0 : index
    %32 = vector.load %arg7[%c0_19, %c0_20, %c0_21] : memref<1x16x32xf32, #tpu.memory_space<vmem>>, vector<1x16x32xf32>
    tpu.vector_store %arg7[%c0_19, %c0_20, %c0_21], %31 {strides = array<i32>} : memref<1x16x32xf32, #tpu.memory_space<vmem>>, vector<1x16x32xf32>,
    return
  }
  func.func @transform_0(%arg0: i32) -> (i32, i32, i32) {
    %c0_i32 = arith.constant 0 : i32
    %c0_i32_0 = arith.constant 0 : i32
    %c0_i32_1 = arith.constant 0 : i32
    return %arg0, %c0_i32, %c0_i32_0 : i32, i32, i32
  }
  func.func @transform_1(%arg0: i32) -> (i32, i32, i32) {
    %c0_i32 = arith.constant 0 : i32
    %c0_i32_0 = arith.constant 0 : i32
    %c0_i32_1 = arith.constant 0 : i32
    return %arg0, %c0_i32, %c0_i32_0 : i32, i32, i32
  }
  func.func @transform_2(%arg0: i32) -> (i32, i32) {
    %c0_i32 = arith.constant 0 : i32
    %c0_i32_0 = arith.constant 0 : i32
    %c0_i32_1 = arith.constant 0 : i32
    return %c0_i32, %c0_i32_0 : i32, i32
  }
  func.func @transform_3(%arg0: i32) -> (i32, i32) {
    %c0_i32 = arith.constant 0 : i32
    %c0_i32_0 = arith.constant 0 : i32
    %c0_i32_1 = arith.constant 0 : i32
    return %c0_i32, %c0_i32_0 : i32, i32
  }
  func.func @transform_4(%arg0: i32) -> (i32, i32) {
    %c0_i32 = arith.constant 0 : i32
    %c0_i32_0 = arith.constant 0 : i32
    %c0_i32_1 = arith.constant 0 : i32
    return %c0_i32, %c0_i32_0 : i32, i32
  }
  func.func @transform_5(%arg0: i32) -> (i32, i32) {
    %c0_i32 = arith.constant 0 : i32
    %c0_i32_0 = arith.constant 0 : i32
    %c0_i32_1 = arith.constant 0 : i32
    return %c0_i32, %c0_i32_0 : i32, i32
  }
  func.func @transform_6(%arg0: i32) -> (i32, i32, i32) {
    %c0_i32 = arith.constant 0 : i32
    %c0_i32_0 = arith.constant 0 : i32
    %c0_i32_1 = arith.constant 0 : i32
    return %arg0, %c0_i32, %c0_i32_0 : i32, i32, i32
  }
}

</mosaic_0001>

<bundles_post_ra>
// kernel: gcn_forward.1
= control target key start
LH: loop header
LB: loop body
LE: loop exit
PB: predicated region body
PF: predicated region fallthrough
CT: control target
= control target key end

     0   :  { %11 = vsyncpa [#allocation3], 0  ;;  %s994_s0 = inlined_call_operand.vmem [shape: bf16[2,16,8], index: 0, kind: input, shape index: {}]   ;;  %s995_s1 = inlined_call_operand.vmem [shape: bf16[2,16,16], index: 1, kind: input, shape index: {}]   ;;  %s996_s2 = inlined_call_operand.vmem [shape: bf16[16,32], index: 2, kind: input, shape index: {}]   ;;  %s997_s3 = inlined_call_operand.vmem [shape: f32[1,32], index: 3, kind: input, shape index: {}]   ;;  %s998_s4 = inlined_call_operand.vmem [shape: bf16[64,32], index: 4, kind: input, shape index: {}]   ;;  %s999_s5 = inlined_call_operand.vmem [shape: f32[1,32], index: 5, kind: input, shape index: {}]   ;;  %s1000_s6 = inlined_call_operand.hbm [shape: f32[2,16,32], index: 6, kind: output, shape index: {}]  }
   0x1   :  { %13 = vsyncpa [#allocation3 + $0x1], 0  ;;  %s855_s21 = smov 0   ;;  %s857_s22 = smov 0  }
   0x2   :  { %s859_s23 = smov 0   ;;  %s861_s24 = smov 0  }
   0x3 LB: > { %s876_s25 = sadd.s32 4294967295, %s812_s24   ;;  %s628_s26 = sadd.s32 4294967294, %s812_s24   ;;  %s812_s24 = sphi %s861_s24, %s1006_s24   ;;  %s808_s23 = sphi %s859_s23, %s1005_s23   ;;  %s804_s22 = sphi %s857_s22, %s1004_s22   ;;  %s800_s21 = sphi %s855_s21, %s1003_s21  }
   0x4   : > { %s880_s27 = sadd.s32 1, %s812_s24   ;;  %s162_s28 = sadd.s32 1, %s808_s23 }
   0x5   : > { %s159_s29 = ssub.s32 %s812_s24, %s880_s27  ;;  %p172_p0 = scmp.ne.s32.totalorder %s808_s23, %s804_s22 }
   0x6   : > { %p160_p1 = scmp.eq.s32.totalorder %s159_s29, 0  ;;  %p173_p2 = scmp.eq.s32.totalorder %s876_s25, 1 }
   0x7   : > { %p178_p3 = scmp.ne.s32.totalorder %s804_s22, %s800_s21  ;;  %p179_p4 = scmp.eq.s32.totalorder %s628_s26, 1 }
   0x8   : > { %s891_s30 = scalar_select %p160_p1, %s808_s23, %s162_s28  }
   0x9   : > { %p893_p5 = por %p173_p2, %p172_p0  ;;  %p897_p6 = por %p179_p4, %p178_p3 }
   0xa   : > { %p631_p7 = scmp.ge.s32.totalorder %s812_s24, 1  ;;  %p225_p8 = scmp.lt.s32.totalorder %s812_s24, 3 }
   0xc   : > { %p226_p9 = pnand %p631_p7, %p225_p8 }
   0xd   : > { %p260_p10 = scmp.lt.s32.totalorder (!%p226_p9), %s876_s25, 1  ;;  %v814_v0 = vmov (!%p226_p9), 0.0   ;;  %vm815_vm0 = vmmov (!%p226_p9), 0   ;;  %vm286_vm1 = vcmask (!%p226_p9), 130048   ;;  %v745_v3 = vld [vmem:[%s996_s2] sm:$0xff] (!%p226_p9)   ;;  %s816_s19 = smov (!%p226_p9), 8  }
   0xe   : > { %229 = sbr.rel (%p226_p9) target bundleno = 1153 (0x481), region = 44  ;;  %669 = vmatprep.subr.bf16.mxu0 (!%p226_p9), %v814_v0  ;;  %671 = vmatprep.mubr.msk.bf16.mxu0 (!%p226_p9), %vm815_vm0, %v814_v0  ;;  %vm335_vm2 = vcmask (!%p226_p9), 64512   ;;  %v640_v11 = vld [vmem:[%s997_s3] ss:$0 sm:$0xff] (!%p226_p9)  ;;  %v747_v22 = vld [vmem:[%s998_s4 + $0x8] sm:$0xff] (!%p226_p9)   ;;  %v748_v23 = vld [vmem:[%s998_s4 + $0x10] sm:$0xff] (!%p226_p9)  }
   0xf   : > { %675 = vmatprep.subr.bf16.mxu1 (!%p226_p9), %v814_v0  ;;  %677 = vmatprep.mubr.msk.bf16.mxu1 (!%p226_p9), %vm815_vm0, %v814_v0  ;;  %v746_v21 = vld [vmem:[%s998_s4] sm:$0xff] (!%p226_p9)   ;;  %v749_v24 = vld [vmem:[%s998_s4 + $0x18] sm:$0xff] (!%p226_p9)   ;;  %s817_s15 = smov (!%p226_p9), 32   ;;  %vm445_vm3 = vcmask (!%p226_p9), 261120   ;;  %vm488_vm4 = vcmask (!%p226_p9), 523264   ;;  %s657_s26 = sshll.u32 (!%p226_p9), %s876_s25, 8 }
  0x10   : > { %676 = vmatpush3.bf16.msra.mxu1 (!%p226_p9), %v745_v3  ;;  %v644_v32 = vld [vmem:[%s999_s5] ss:$0 sm:$0xff] (!%p226_p9)  ;;  %s946_s11 = scalar_lea.hbm (!%p226_p9), %s1000_s6, %s657_s26 }
  0x11   : > { %687 = vmatprep.subr.bf16.mxu1 (!%p226_p9), %v814_v0 }
  0x15   : > { %s261_s9 = scalar_select %p260_p10, %s876_s25, 1 }
  0x17   : > { %s655_s10 = sshll.u32 %s261_s9, 3 }
  0x18   : > { %s264_s13 = scalar_lea.vmem %s994_s0, %s655_s10  ;;  %s269_s16 = scalar_lea.vmem %s995_s1, %s655_s10 }
  0x19   : > { %v743_v1 = vld [vmem:[%s264_s13] sm:$0xff]   ;;  %s818_s13 = smov [#allocation2]  }
  0x1a   : > { %v744_v2 = vld [vmem:[%s269_s16] sm:$0xff]   ;;  %670 = vmatpush3.bf16.msra.mxu0 %v743_v1  ;;  %s257_s16 = sand.u32 1, %s804_s22   ;;  %s754_s14 = sshll.u32 %s818_s13, 4  ;;  %s755_s14 = int_to_ptr.vmem [resolvable:$false] %s754_s14 }
  0x1b   : > { %681 = vmatprep.subr.bf16.mxu0 %v814_v0  ;;  %s632_s20 = sshll.u32 %s257_s16, 4  ;;  %s952_s25 = scalar_lea.sflag [#allocation3], %s257_s16 }
  0x1c   : > { %s259_s28 = scalar_lea.vmem [#allocation2], %s632_s20 }
  0x1d   : > { %672 = vmatmul.mubr.msk.bf16.vlgmr.msra.gmra.mrb[0].mxu0 %vm286_vm1, %v744_v2  ;;  %s554_s29 = sshll.u32 %s259_s28, 4  ;;  %s949_s29 = int_to_ptr.vmem [resolvable:$true] %s554_s29 }
  0x1e   : > { %683 = vmatprep.mubr.msk.bf16.mxu0 %vm815_vm0, %v814_v0  ;;  %s750_s12 = scalar_lea.vmem %s949_s29, 256  ;;  %p757_p0 = scmp.lt.s32.totalorder %s949_s29, %s755_s14 }
  0x1f   : > { %p751_p11 = scmp.ne.s32.totalorder %s949_s29, %s750_s12 }
  0x21   : > { %p752_p12 = pnand %p751_p11, %p893_p5 }
  0x23   : > { %p753_p13 = pneg %p752_p12 }
  0xf0   : > { %v324_v4 = vpop.f32.mrb[0].mxu0 }
  0xf1   : > { %v673_v5 = vpop.f32.mrb[1].mxu0 }
  0xf2   : > { %v327_v6 = vpop.f32.mrb[2].mxu0 }
  0xf3   : > { %v331_v7 = vpack.c.bf16 %v327_v6, %v324_v4  ;;  %v674_v8 = vpop.f32.mrb[3].mxu0 }
  0xf5   : > { %333 = vrot.lane.b32.xlu0 %v331_v7, %s816_s19 }
 0x167   : > { %v334_v9 = vpop.permute.xlu0 %333 }
 0x168   : > { %v338_v10 = vsel %vm335_vm2, %v743_v1, %v334_v9 }
 0x169   : > { %678 = vmatmul.mubr.msk.bf16.vlgmr.msra.gmra.mrb[0].mxu1 %vm286_vm1, %v338_v10 }
 0x16a   : > { %695 = vmatprep.mubr.msk.bf16.mxu1 %vm815_vm0, %v814_v0  ;;  %688 = vmatpush3.bf16.msra.mxu1 %v746_v21 }
 0x16b   : > { %689 = vmatprep.subr.bf16.mxu1 %v814_v0 }
 0x16e   : > { %690 = vmatpush3.bf16.msra.mxu1 %v747_v22 }
 0x16f   : > { %691 = vmatprep.subr.bf16.mxu1 %v814_v0 }
 0x172   : > { %692 = vmatpush3.bf16.msra.mxu1 %v748_v23 }
 0x173   : > { %693 = vmatprep.subr.bf16.mxu1 %v814_v0 }
 0x176   : > { %694 = vmatpush3.bf16.msra.mxu1 %v749_v24 }
 0x23c   : > { %v390_v12 = vpop.f32.mrb[0].mxu1 }
 0x23d   : > { %v391_v13 = vadd.f32 %v640_v11, %v390_v12  ;;  %v679_v14 = vpop.f32.mrb[1].mxu1 }
 0x23e   : > { %v393_v15 = vpop.f32.mrb[2].mxu1 }
 0x23f   : > { %v394_v16 = vadd.f32 %v640_v11, %v393_v15  ;;  %v680_v17 = vpop.f32.mrb[3].mxu1  ;;  %v397_v18 = vmax.f32 %v391_v13, 0.0 }
 0x241   : > { %v398_v19 = vmax.f32 %v394_v16, 0.0 }
 0x243   : > { %v399_v20 = vpack.c.bf16 %v398_v19, %v397_v18 }
 0x245   : > { %682 = vmatpush3.bf16.msra.mxu0 %v399_v20 }
 0x248   : > { %684 = vmatmul.mubr.msk.bf16.vlgmr.msra.gmra.mrb[4].mxu0 %vm286_vm1, %v744_v2 }
 0x31b   : > { %v434_v25 = vpop.f32.mrb[4].mxu0 }
 0x31c   : > { %v685_v26 = vpop.f32.mrb[5].mxu0 }
 0x31d   : > { %v437_v27 = vpop.f32.mrb[6].mxu0 }
 0x31e   : > { %v441_v28 = vpack.c.bf16 %v437_v27, %v434_v25  ;;  %v686_v29 = vpop.f32.mrb[7].mxu0 }
 0x320   : > { %443 = vrot.lane.b32.xlu0 %v441_v28, %s817_s15  ;;  %s756_s15 = scalar_lea.vmem %s755_s14, 512 }
 0x321   : > { %p758_p1 = scmp.lt.s32.totalorder %s756_s15, %s750_s12 }
 0x323   : > { %p759_p2 = por %p758_p1, %p757_p0 }
 0x325   : > { %p760_p3 = pnand %p759_p2, %p753_p13 }
 0x392   : > { %v444_v30 = vpop.permute.xlu0 %443 }
 0x393   : > { %v448_v31 = vsel %vm445_vm3, %v399_v20, %v444_v30 }
 0x394   : > { %696 = vmatmul.mubr.msk.bf16.vlgmr.msra.gmra.mrb[4].mxu1 %vm488_vm4, %v448_v31 }
 0x467   : > { %v525_v33 = vpop.f32.mrb[4].mxu1 }
 0x468   : > { %v526_v34 = vadd.f32 %v644_v32, %v525_v33  ;;  %v697_v35 = vpop.f32.mrb[5].mxu1 }
 0x469   : > { %v528_v36 = vpop.f32.mrb[6].mxu1 }
 0x46a   : > { %v532_v37 = vmax.f32 %v526_v34, 0.0  ;;  %v529_v38 = vadd.f32 %v644_v32, %v528_v36  ;;  %v698_v39 = vpop.f32.mrb[7].mxu1 }
 0x46c   : > { %v534_v40 = vadd.f32 %v532_v37, %v397_v18  ;;  %v533_v41 = vmax.f32 %v529_v38, 0.0 }
 0x46e   : > { %v536_v42 = vmax.f32 %v534_v40, 0.0  ;;  %v535_v43 = vadd.f32 %v533_v41, %v398_v19 }
 0x470   : > { %538 = vst.msk [vmem:[%s259_s28] sm:$0xff] %vm445_vm3, %v536_v42  ;;  %v537_v44 = vmax.f32 %v535_v43, 0.0 }
 0x472   : > { %539 = vst.msk [vmem:[%s259_s28 + $0x8] sm:$0xff] %vm445_vm3, %v537_v44 }
 0x473   : > { %763 = shalt.err (!%p760_p3)
}
 0x474   : > { %s764_s16 = scalar_lea.hbm %s946_s11, 256  ;;  %s768_s20 = scalar_lea.hbm %s1000_s6, 512 }
 0x475   : > { %p765_p4 = scmp.ne.s32.totalorder %s946_s11, %s764_s16  ;;  %p769_p9 = scmp.lt.u32.totalorder %s946_s11, %s1000_s6 }
 0x476   : > { %p770_p10 = scmp.lt.u32.totalorder %s768_s20, %s764_s16  ;;  %p772_p12 = scmp.lt.u32.totalorder %s764_s16, %s946_s11 }
 0x477   : > { %p766_p7 = pnand %p765_p4, %p893_p5 }
 0x478   : > { %p771_p11 = por %p770_p10, %p769_p9 }
 0x479   : > { %p767_p8 = pneg %p766_p7 }
 0x47a   : > { %p773_p13 = por %p772_p12, %p771_p11 }
 0x47c   : > { %p774_p0 = pnand %p773_p13, %p767_p8 }
 0x47e   : > { %777 = shalt.err (!%p774_p0)
}
 0x47f   : > { %s819_s9 = smov 128  }
 0x480   : > { %699 = dma.vmem_to_hbm [thread:$0]  (%p893_p5), %s949_s29, 256, %s946_s11, %s952_s25, %s819_s9, %s819_s9, %s816_s19  }
 0x481 PF: > { %p705_p1 = scmp.ge.s32.totalorder %s812_s24, 2  ;;  %s569_s10 = sand.u32 1, %s800_s21  }
 0x482   : > { %s570_s12 = scalar_lea.sflag [#allocation3], %s569_s10 }
 0x483   : > { %p702_p2 = pnand %p705_p1, %p897_p6 }
 0x485   : > { %795 = dma.done.wait (!%p702_p2), %s570_s12, 256  }
 0x486   : > { %797 = vsyncadd (!%p702_p2), %s570_s12, 4294967040  ;;  %p16_p3 = scmp.ge.s32.totalorder %s880_s27, 4   ;;  %s1003_s21 = smov %s804_s22 }
 0x487   : > { %s1004_s22 = smov %s808_s23  ;;  %s1005_s23 = smov %s891_s30 }
 0x488   : > { %s1006_s24 = smov %s880_s27  ;;  %18 = sbr.rel (!%p16_p3) target bundleno = 3 (0x3), region = 82 }
 0x48f   :  { %575 = vsyncpa [#allocation3], 1 }
 0x490   :  { %577 = vsyncpa [#allocation3 + $0x1], 1 }

</bundles_post_ra>
